<compile_context>
chip_gen: v7x
topology: tpu7x:2x2x1
jax: 0.10.0
libtpu: 0.0.40
codegen_flags: <defaults>
</compile_context>

<pallas_src>
import functools
import numpy as np

import jax
import jax.numpy as jnp
from jax.experimental import pallas as pl
from jax.experimental.pallas import tpu as pltpu

# ---------------- scaled-down config (original values in comments) ----------------
N_DIM = 128          # 1024
N_HEADS = 4          # 16
N_DIM_HEAD = 32      # 16   (kept N_HEADS * N_DIM_HEAD == N_DIM)
N_DIM_FFN = 256      # 4096
N_LAYERS = 2         # 12
MAX_SEQ_LEN = 64     # 8 * 1024
TEXT_VOCAB = 256     # 8 * 1024
N_CLASSES = 128      # 1024
AUDIO_VOCAB = N_CLASSES + 1

ROW_TILE_CAP = 256   # dense-kernel row tile cap (v7x-safe; 384-512 OK on v5e/v6e)
ATT_TILE_CAP = 256   # attention TQ == TK cap
LN_EPS = 1e-5


def _pick_tile(m, cap):
    t = cap
    while t > 128 and m % t != 0:
        t //= 2
    assert m % t == 0, (m, t)
    return t


def _sem(*kinds):
    return pltpu.CompilerParams(dimension_semantics=tuple(kinds))


def _gelu(x):
    # TODO(synk): torch.nn.GELU defaults to the exact erf form; tanh approximation used.
    c = jnp.float32(0.7978845608028654)   # sqrt(2/pi)
    return 0.5 * x * (1.0 + jnp.tanh(c * (x + 0.044715 * x * x * x)))


def _layernorm(x, g, b):
    mu = jnp.mean(x, axis=-1, keepdims=True)
    xc = x - mu
    var = jnp.mean(xc * xc, axis=-1, keepdims=True)
    return xc * jax.lax.rsqrt(var + LN_EPS) * g + b


# ------------------------------ dense kernels ------------------------------

def _matmul_nobias_kernel(x_ref, w_ref, o_ref):
    o_ref[...] = jnp.dot(x_ref[...], w_ref[...],
                         preferred_element_type=jnp.float32).astype(o_ref.dtype)


def matmul_nobias(x, w, out_dtype=jnp.bfloat16):
    M, K = x.shape
    N = w.shape[1]
    tm = _pick_tile(M, ROW_TILE_CAP)
    return pl.pallas_call(
        _matmul_nobias_kernel,
        out_shape=jax.ShapeDtypeStruct((M, N), out_dtype),
        grid=(M // tm,),
        in_specs=[pl.BlockSpec((tm, K), lambda i: (i, 0)),
                  pl.BlockSpec((K, N), lambda i: (0, 0))],
        out_specs=pl.BlockSpec((tm, N), lambda i: (i, 0)),
        compiler_params=_sem("parallel"),
    )(x, w)


def _ln_linear_kernel(x_ref, g_ref, b_ref, w_ref, bias_ref, o_ref, *, act):
    h = _layernorm(x_ref[...].astype(jnp.float32), g_ref[...], b_ref[...])
    acc = jnp.dot(h.astype(jnp.bfloat16), w_ref[...],
                  preferred_element_type=jnp.float32) + bias_ref[...]
    if act == "gelu":
        acc = _gelu(acc)
    o_ref[...] = acc.astype(o_ref.dtype)


def ln_linear(x, g, b, w, bias, act="none", out_dtype=jnp.bfloat16):
    M, D = x.shape
    N = w.shape[1]
    tm = _pick_tile(M, ROW_TILE_CAP)
    return pl.pallas_call(
        functools.partial(_ln_linear_kernel, act=act),
        out_shape=jax.ShapeDtypeStruct((M, N), out_dtype),
        grid=(M // tm,),
        in_specs=[pl.BlockSpec((tm, D), lambda i: (i, 0)),
                  pl.BlockSpec((1, D), lambda i: (0, 0)),
                  pl.BlockSpec((1, D), lambda i: (0, 0)),
                  pl.BlockSpec((D, N), lambda i: (0, 0)),
                  pl.BlockSpec((1, N), lambda i: (0, 0))],
        out_specs=pl.BlockSpec((tm, N), lambda i: (i, 0)),
        compiler_params=_sem("parallel"),
    )(x, g.reshape(1, D), b.reshape(1, D), w, bias.reshape(1, N))


def _residual_ln_linear_kernel(x_ref, wr_ref, br_ref, res_ref, g_ref, b_ref,
                               wn_ref, bn_ref, newres_ref, o_ref, *, act):
    # (x @ w_res + b_res + residual) kept resident in VMEM, then LN + next matmul.
    acc = jnp.dot(x_ref[...], wr_ref[...], preferred_element_type=jnp.float32)
    new_res = res_ref[...].astype(jnp.float32) + acc + br_ref[...]
    newres_ref[...] = new_res.astype(newres_ref.dtype)
    h = _layernorm(new_res, g_ref[...], b_ref[...])
    o = jnp.dot(h.astype(jnp.bfloat16), wn_ref[...],
                preferred_element_type=jnp.float32) + bn_ref[...]
    if act == "gelu":
        o = _gelu(o)
    o_ref[...] = o.astype(o_ref.dtype)


def residual_ln_linear(x, w_res, b_res, residual, g, b, w_next, b_next, act="none"):
    M, K = x.shape
    D = w_res.shape[1]
    N = w_next.shape[1]
    tm = _pick_tile(M, ROW_TILE_CAP)
    return pl.pallas_call(
        functools.partial(_residual_ln_linear_kernel, act=act),
        out_shape=(jax.ShapeDtypeStruct((M, D), jnp.bfloat16),
                   jax.ShapeDtypeStruct((M, N), jnp.bfloat16)),
        grid=(M // tm,),
        in_specs=[pl.BlockSpec((tm, K), lambda i: (i, 0)),
                  pl.BlockSpec((K, D), lambda i: (0, 0)),
                  pl.BlockSpec((1, D), lambda i: (0, 0)),
                  pl.BlockSpec((tm, D), lambda i: (i, 0)),
                  pl.BlockSpec((1, D), lambda i: (0, 0)),
                  pl.BlockSpec((1, D), lambda i: (0, 0)),
                  pl.BlockSpec((D, N), lambda i: (0, 0)),
                  pl.BlockSpec((1, N), lambda i: (0, 0))],
        out_specs=(pl.BlockSpec((tm, D), lambda i: (i, 0)),
                   pl.BlockSpec((tm, N), lambda i: (i, 0))),
        compiler_params=_sem("parallel"),
    )(x, w_res, b_res.reshape(1, D), residual, g.reshape(1, D), b.reshape(1, D),
      w_next, b_next.reshape(1, N))


def _residual_ln_pred_xent_kernel(x_ref, wr_ref, br_ref, res_ref, g_ref, b_ref,
                                  wp_ref, bp_ref, tgt_ref, msk_ref,
                                  logits_ref, rowloss_ref):
    # last layer: FFN-down + residual + final LN + prediction + per-row cross-entropy.
    acc = jnp.dot(x_ref[...], wr_ref[...], preferred_element_type=jnp.float32)
    new_res = res_ref[...].astype(jnp.float32) + acc + br_ref[...]
    h = _layernorm(new_res, g_ref[...], b_ref[...])
    logits = jnp.dot(h.astype(jnp.bfloat16), wp_ref[...],
                     preferred_element_type=jnp.float32) + bp_ref[...]
    logits_ref[...] = logits
    m = jnp.max(logits, axis=-1, keepdims=True)
    lse = jnp.log(jnp.sum(jnp.exp(logits - m), axis=-1, keepdims=True)) + m
    onehot = jax.lax.broadcasted_iota(jnp.int32, logits.shape, 1) == tgt_ref[...]
    picked = jnp.sum(jnp.where(onehot, logits, 0.0), axis=-1, keepdims=True)
    rowloss_ref[...] = (lse - picked) * msk_ref[...]


def residual_ln_pred_xent(x, w_res, b_res, residual, g, b, w_pred, b_pred, tgt, msk):
    M, K = x.shape
    D = w_res.shape[1]
    C = w_pred.shape[1]
    tm = _pick_tile(M, ROW_TILE_CAP)
    return pl.pallas_call(
        _residual_ln_pred_xent_kernel,
        out_shape=(jax.ShapeDtypeStruct((M, C), jnp.float32),
                   jax.ShapeDtypeStruct((M, 1), jnp.float32)),
        grid=(M // tm,),
        in_specs=[pl.BlockSpec((tm, K), lambda i: (i, 0)),
                  pl.BlockSpec((K, D), lambda i: (0, 0)),
                  pl.BlockSpec((1, D), lambda i: (0, 0)),
                  pl.BlockSpec((tm, D), lambda i: (i, 0)),
                  pl.BlockSpec((1, D), lambda i: (0, 0)),
                  pl.BlockSpec((1, D), lambda i: (0, 0)),
                  pl.BlockSpec((D, C), lambda i: (0, 0)),
                  pl.BlockSpec((1, C), lambda i: (0, 0)),
                  pl.BlockSpec((tm, 1), lambda i: (i, 0)),
                  pl.BlockSpec((tm, 1), lambda i: (i, 0))],
        out_specs=(pl.BlockSpec((tm, C), lambda i: (i, 0)),
                   pl.BlockSpec((tm, 1), lambda i: (i, 0))),
        compiler_params=_sem("parallel"),
    )(x, w_res, b_res.reshape(1, D), residual, g.reshape(1, D), b.reshape(1, D),
      w_pred, b_pred.reshape(1, C), tgt, msk)


# ------------------------------ block-sparse flash attention ------------------------------

def _flash_attn_kernel(kvs_ref, kvn_ref, q_ref, k_ref, v_ref, segq_ref, segk_ref,
                       o_ref, m_sc, l_sc, acc_sc):
    qi = pl.program_id(0)
    ki = pl.program_id(1)
    tq = q_ref.shape[0]
    n_kv = kvn_ref[qi]

    @pl.when(ki == 0)
    def _():
        # -1e9 sentinel (mask fill is -1e30): fully-masked rows/tiles give exp()->0
        # without any extra select.
        m_sc[...] = jnp.full_like(m_sc, -1e9)
        l_sc[...] = jnp.zeros_like(l_sc)
        acc_sc[...] = jnp.zeros_like(acc_sc)

    @pl.when(ki < n_kv)
    def _():
        k_blk = kvs_ref[qi] + ki
        seg_q = segq_ref[...]                              # (tq, 1) int32
        seg_k = segk_ref[pl.ds(k_blk, 1), :]               # (1, tk) int32, full-block slice
        bias = jnp.where(seg_q == seg_k, 0.0, -1e30).astype(jnp.float32)

        q = q_ref[...]                                     # (tq, D) bf16 (Q pre-scaled)
        k = k_ref[...]                                     # (tk, D) bf16
        v = v_ref[...]                                     # (tk, D) bf16
        m_old = m_sc[...]                                  # (tq, H)

        m_new_l, alpha_l, lsum_l, pv_l = [], [], [], []
        for h in range(N_HEADS):
            c0 = h * N_DIM_HEAD
            c1 = c0 + N_DIM_HEAD
            s = jax.lax.dot_general(q[:, c0:c1], k[:, c0:c1],
                                    (((1,), (1,)), ((), ())),
                                    preferred_element_type=jnp.float32) + bias
            m_o = m_old[:, h:h + 1]
            m_n = jnp.maximum(m_o, jnp.max(s, axis=-1, keepdims=True))
            p = jnp.exp(s - m_n)                           # masked entries underflow to 0
            m_new_l.append(m_n)
            alpha_l.append(jnp.exp(m_o - m_n))
            lsum_l.append(jnp.sum(p, axis=-1, keepdims=True))
            pv_l.append(jax.lax.dot_general(p.astype(v.dtype), v[:, c0:c1],
                                            (((1,), (0,)), ((), ())),
                                            preferred_element_type=jnp.float32))

        # lane-dense scratch updates (single full-width stores)
        alpha = jnp.concatenate(alpha_l, axis=1)                               # (tq, H)
        alpha_wide = jnp.concatenate(
            [jnp.broadcast_to(a, (tq, N_DIM_HEAD)) for a in alpha_l], axis=1)  # (tq, D)
        m_sc[...] = jnp.concatenate(m_new_l, axis=1)
        l_sc[...] = alpha * l_sc[...] + jnp.concatenate(lsum_l, axis=1)
        acc_sc[...] = alpha_wide * acc_sc[...] + jnp.concatenate(pv_l, axis=1)

    @pl.when(ki == pl.num_programs(1) - 1)
    def _():
        inv = 1.0 / l_sc[...]                              # exact reciprocal (correctness)
        inv_wide = jnp.concatenate(
            [jnp.broadcast_to(inv[:, h:h + 1], (tq, N_DIM_HEAD))
             for h in range(N_HEADS)], axis=1)
        o_ref[...] = (acc_sc[...] * inv_wide).astype(o_ref.dtype)


def attention(qkv, seg_rows, seg_kv, kv_start, kv_num, max_kv):
    # qkv: (Tp, 3*N_DIM) bf16 packed [Q | K | V]; kv_start/kv_num: per-q-tile kv ranges.
    Tp = qkv.shape[0]
    tq = _pick_tile(Tp, ATT_TILE_CAP)
    tk = tq
    n_q = Tp // tq
    assert seg_kv.shape == (Tp // tk, tk)

    grid_spec = pltpu.PrefetchScalarGridSpec(
        num_scalar_prefetch=2,
        grid=(n_q, max_kv),
        in_specs=[
            pl.BlockSpec((tq, N_DIM), lambda qi, ki, kvs, kvn: (qi, 0)),
            pl.BlockSpec((tk, N_DIM),
                         lambda qi, ki, kvs, kvn:
                         (kvs[qi] + jnp.minimum(ki, kvn[qi] - 1), 1)),
            pl.BlockSpec((tk, N_DIM),
                         lambda qi, ki, kvs, kvn:
                         (kvs[qi] + jnp.minimum(ki, kvn[qi] - 1), 2)),
            pl.BlockSpec((tq, 1), lambda qi, ki, kvs, kvn: (qi, 0)),
            pl.BlockSpec((Tp // tk, tk), lambda qi, ki, kvs, kvn: (0, 0)),  # DMA'd once
        ],
        out_specs=pl.BlockSpec((tq, N_DIM), lambda qi, ki, kvs, kvn: (qi, 0)),
        scratch_shapes=[pltpu.VMEM((tq, N_HEADS), jnp.float32),   # running max
                        pltpu.VMEM((tq, N_HEADS), jnp.float32),   # running denom
                        pltpu.VMEM((tq, N_DIM), jnp.float32)],    # output accumulator
    )
    return pl.pallas_call(
        _flash_attn_kernel,
        out_shape=jax.ShapeDtypeStruct((Tp, N_DIM), jnp.bfloat16),
        grid_spec=grid_spec,
        compiler_params=_sem("parallel", "arbitrary"),
    )(kv_start, kv_num, qkv, qkv, qkv, seg_rows, seg_kv)


# ------------------------------ parameters ------------------------------

def init_params(key):
    std = 0.02
    ks = jax.random.split(key, 8)

    def norm(k, shape):
        return jax.random.normal(k, shape, jnp.float32) * std

    scale = 1.0 / float(N_DIM_HEAD) ** 0.5
    p = {
        "pos_text": norm(ks[0], (MAX_SEQ_LEN, N_DIM)),
        "pos_audio": norm(ks[1], (MAX_SEQ_LEN, N_DIM)),
        "text_emb": norm(ks[2], (TEXT_VOCAB, N_DIM)),
        "audio_emb": norm(ks[3], (AUDIO_VOCAB, N_DIM)),
        "w_in": norm(ks[4], (2 * N_DIM, N_DIM)).astype(jnp.bfloat16),  # no bias
        "lnf_g": jnp.ones((N_DIM,), jnp.float32),
        "lnf_b": jnp.zeros((N_DIM,), jnp.float32),
        "w_pred": norm(ks[5], (N_DIM, N_CLASSES)).astype(jnp.bfloat16),
        "b_pred": jnp.zeros((N_CLASSES,), jnp.float32),
    }
    kk = jax.random.split(ks[6], N_LAYERS * 4)
    layers = []
    for l in range(N_LAYERS):
        b = l * 4
        w_qkv = norm(kk[b + 0], (N_DIM, 3 * N_DIM))
        # fold the 1/sqrt(d_head) attention scale into the Q columns (perf review);
        # the Q bias columns would be scaled too, but they are zero-initialized.
        w_qkv = w_qkv.at[:, :N_DIM].multiply(scale)
        layers.append(dict(
            ln1_g=jnp.ones((N_DIM,), jnp.float32), ln1_b=jnp.zeros((N_DIM,), jnp.float32),
            w_qkv=w_qkv.astype(jnp.bfloat16),
            b_qkv=jnp.zeros((3 * N_DIM,), jnp.float32),
            wo=norm(kk[b + 1], (N_DIM, N_DIM)).astype(jnp.bfloat16),
            bo=jnp.zeros((N_DIM,), jnp.float32),
            ln2_g=jnp.ones((N_DIM,), jnp.float32), ln2_b=jnp.zeros((N_DIM,), jnp.float32),
            w1=norm(kk[b + 2], (N_DIM, N_DIM_FFN)).astype(jnp.bfloat16),
            b1=jnp.zeros((N_DIM_FFN,), jnp.float32),
            w2=norm(kk[b + 3], (N_DIM_FFN, N_DIM)).astype(jnp.bfloat16),
            b2=jnp.zeros((N_DIM,), jnp.float32),
        ))
    p["layers"] = layers
    return p


# ------------------------------ forward ------------------------------

def forward(params, condition_text, condition_audio, duration, target):
    B = len(condition_text)
    assert len(condition_audio) == B and len(duration) == B and len(target) == B

    # ---- host glue: flattened token ids, positions, segment ids, target/loss-mask rows ----
    text_ids, audio_ids, pos_ids, seg_ids, tgt_rows, msk_rows = [], [], [], [], [], []
    for i in range(B):
        d = int(duration[i])
        ct = np.asarray(condition_text[i])
        ca = np.asarray(condition_audio[i])
        tg = np.asarray(target[i])
        assert ct.ndim == 1 and ca.ndim == 1
        assert ct.shape[0] <= d and ca.shape[0] <= d
        assert tg.shape[0] + ca.shape[0] == d
        text_ids.append(np.pad(ct, (0, d - ct.shape[0])))
        audio_ids.append(np.pad(ca + 1, (0, d - ca.shape[0])))  # +1 shift (0 = pad token)
        pos_ids.append(np.arange(d))
        seg_ids.append(np.full((d,), i))
        tg_row = np.zeros((d,), np.int64)
        tg_row[d - tg.shape[0]:] = tg
        mk_row = np.zeros((d,), np.float32)
        mk_row[d - tg.shape[0]:] = 1.0
        tgt_rows.append(tg_row)
        msk_rows.append(mk_row)
    text_ids = np.concatenate(text_ids)
    audio_ids = np.concatenate(audio_ids)
    pos_ids = np.concatenate(pos_ids)
    seg_ids = np.concatenate(seg_ids)
    tgt_full = np.concatenate(tgt_rows)
    loss_mask = np.concatenate(msk_rows)

    T = int(text_ids.shape[0])
    Tp = ((T + 127) // 128) * 128
    pad = Tp - T
    text_ids = np.pad(text_ids, (0, pad))
    audio_ids = np.pad(audio_ids, (0, pad))
    pos_ids = np.pad(pos_ids, (0, pad))
    seg_ids = np.concatenate([seg_ids, B + np.arange(pad)])   # each pad token = own segment
    tgt_full = np.pad(tgt_full, (0, pad))
    loss_mask = np.pad(loss_mask, (0, pad))

    # ---- block-sparse attention metadata: per-q-tile kv tile range (host glue) ----
    att_tile = _pick_tile(Tp, ATT_TILE_CAP)
    n_q = Tp // att_tile
    kv_start = np.zeros((n_q,), np.int32)
    kv_num = np.zeros((n_q,), np.int32)
    for qi in range(n_q):
        smin = seg_ids[qi * att_tile]
        smax = seg_ids[(qi + 1) * att_tile - 1]
        lo = int(np.searchsorted(seg_ids, smin, "left"))
        hi = int(np.searchsorted(seg_ids, smax, "right"))
        kv_start[qi] = lo // att_tile
        kv_num[qi] = (hi - 1) // att_tile - kv_start[qi] + 1
    max_kv = int(kv_num.max())
    # TODO(synk): at demo size every parallel grid axis has a single tile; v7x megacore
    #             only engages at real T (grid >= 2 tiles on the parallel axes).

    text_ids = jnp.asarray(text_ids, jnp.int32)
    audio_ids = jnp.asarray(audio_ids, jnp.int32)
    pos_ids = jnp.asarray(pos_ids, jnp.int32)
    seg_rows = jnp.asarray(seg_ids, jnp.int32).reshape(Tp, 1)
    seg_kv = jnp.asarray(seg_ids, jnp.int32).reshape(Tp // att_tile, att_tile)
    kv_start = jnp.asarray(kv_start, jnp.int32)
    kv_num = jnp.asarray(kv_num, jnp.int32)
    tgt_col = jnp.asarray(tgt_full, jnp.int32).reshape(Tp, 1)
    msk_col = jnp.asarray(loss_mask, jnp.float32).reshape(Tp, 1)

    # ---- embeddings (gather is glue) + positional ----
    e_text = params["text_emb"][text_ids] + params["pos_text"][pos_ids]
    e_audio = params["audio_emb"][audio_ids] + params["pos_audio"][pos_ids]
    x2 = jnp.concatenate([e_text, e_audio], axis=-1).astype(jnp.bfloat16)

    # input_projection (Linear, no bias)
    x = matmul_nobias(x2, params["w_in"])                    # (Tp, N_DIM) bf16 residual

    layers = params["layers"]
    # layer-0 QKV: LN1 fused with the (D, 3D) QKV matmul
    qkv = ln_linear(x, layers[0]["ln1_g"], layers[0]["ln1_b"],
                    layers[0]["w_qkv"], layers[0]["b_qkv"])

    logits = None
    rowloss = None
    for l in range(N_LAYERS):
        layer = layers[l]
        # block-sparse flash attention over the segment (duration) mask
        o = attention(qkv, seg_rows, seg_kv, kv_start, kv_num, max_kv)
        # fused: Wo + bias + residual  ->  LN2 + FFN-up + GELU
        x, f = residual_ln_linear(o, layer["wo"], layer["bo"], x,
                                  layer["ln2_g"], layer["ln2_b"],
                                  layer["w1"], layer["b1"], act="gelu")
        if l + 1 < N_LAYERS:
            nxt = layers[l + 1]
            # fused: FFN-down + residual  ->  next layer's LN1 + QKV
            x, qkv = residual_ln_linear(f, layer["w2"], layer["b2"], x,
                                        nxt["ln1_g"], nxt["ln1_b"],
                                        nxt["w_qkv"], nxt["b_qkv"])
        else:
            # fused: FFN-down + residual -> final LN + prediction + per-row cross-entropy
            logits, rowloss = residual_ln_pred_xent(
                f, layer["w2"], layer["b2"], x,
                params["lnf_g"], params["lnf_b"],
                params["w_pred"], params["b_pred"], tgt_col, msk_col)

    # ---- per-sequence prediction slicing (glue) ----
    predicted = []
    offset = 0
    for i in range(B):
        d = int(duration[i])
        tl = int(np.asarray(target[i]).shape[0])
        predicted.append(logits[offset + (d - tl): offset + d])
        offset += d

    # ---- cross-entropy mean (row losses already computed in-kernel, masked) ----
    n_target = sum(int(np.asarray(t).shape[0]) for t in target)
    loss = jnp.sum(rowloss) / float(n_target)
    return predicted, loss


# ------------------------------ demo ------------------------------

if __name__ == "__main__":
    key = jax.random.PRNGKey(0)
    pkey, dkey = jax.random.split(key)
    params = init_params(pkey)

    ks = jax.random.split(dkey, 6)
    duration = [10, 12]
    text_lens = [5, 7]
    audio_lens = [3, 4]
    condition_text = [
        jax.random.randint(ks[i], (text_lens[i],), 0, TEXT_VOCAB, jnp.int32) for i in range(2)
    ]
    condition_audio = [
        jax.random.randint(ks[2 + i], (audio_lens[i],), 0, N_CLASSES, jnp.int32) for i in range(2)
    ]
    target = [
        jax.random.randint(ks[4 + i], (duration[i] - audio_lens[i],), 0, N_CLASSES, jnp.int32)
        for i in range(2)
    ]

    predicted, loss = forward(params, condition_text, condition_audio, duration, target)
    jax.block_until_ready(loss)
    for p in predicted:
        jax.block_until_ready(p)
    assert predicted[0].shape == (duration[0] - audio_lens[0], N_CLASSES)
    assert predicted[1].shape == (duration[1] - audio_lens[1], N_CLASSES)
    assert bool(jnp.isfinite(loss))
    print("KERNEL_OK")
</pallas_src>

<mosaic_0001>
module attributes {stable_mosaic.version = 11 : i64} {
  func.func @_matmul_nobias_kernel(%arg0: i32, %arg1: memref<128x256xbf16, #tpu.memory_space<vmem>>, %arg2: memref<256x128xbf16, #tpu.memory_space<vmem>>, %arg3: memref<128x128xbf16, #tpu.memory_space<vmem>>) attributes {dimension_semantics = [#tpu.dimension_semantics<parallel>], iteration_bounds = array<i64: 1>, scalar_prefetch = 0 : i64, scratch_operands = 0 : i64, tpu.core_type = #tpu.core_type<tc>, window_params = [{transform_indices = @transform_0, window_bounds = array<i64: 128, 256>}, {pipeline_mode = #tpu.pipeline_mode<synchronous>, transform_indices = @transform_1, window_bounds = array<i64: 256, 128>}, {transform_indices = @transform_2, window_bounds = array<i64: 128, 128>}]} {
    %c0 = arith.constant 0 : index
    %c0_0 = arith.constant 0 : index
    %0 = vector.load %arg1[%c0, %c0_0] : memref<128x256xbf16, #tpu.memory_space<vmem>>, vector<128x256xbf16>
    %c0_1 = arith.constant 0 : index
    %c0_2 = arith.constant 0 : index
    %1 = vector.load %arg2[%c0_1, %c0_2] : memref<256x128xbf16, #tpu.memory_space<vmem>>, vector<256x128xbf16>
    %cst = arith.constant dense<0.000000e+00> : vector<128x128xf32>
    %2 = tpu.matmul %0, %1, %cst {dimension_numbers = #tpu.dot_dimension_numbers<[1], [0], [0], [1], [0, 0, 1, 1], [], []>} : vector<128x256xbf16>, vector<256x128xbf16>, vector<128x128xf32> -> vector<128x128xf32>
    %3 = arith.truncf %2 : vector<128x128xf32> to vector<128x128xbf16>
    %c0_3 = arith.constant 0 : index
    %c0_4 = arith.constant 0 : index
    %4 = vector.load %arg3[%c0_3, %c0_4] : memref<128x128xbf16, #tpu.memory_space<vmem>>, vector<128x128xbf16>
    tpu.vector_store %arg3[%c0_3, %c0_4], %3 {strides = array<i32>} : memref<128x128xbf16, #tpu.memory_space<vmem>>, vector<128x128xbf16>,
    return
  }
  func.func @transform_0(%arg0: i32) -> (i32, i32) {
    %c0_i32 = arith.constant 0 : i32
    %c0_i32_0 = arith.constant 0 : i32
    return %arg0, %c0_i32 : i32, i32
  }
  func.func @transform_1(%arg0: i32) -> (i32, i32) {
    %c0_i32 = arith.constant 0 : i32
    %c0_i32_0 = arith.constant 0 : i32
    %c0_i32_1 = arith.constant 0 : i32
    return %c0_i32, %c0_i32_0 : i32, i32
  }
  func.func @transform_2(%arg0: i32) -> (i32, i32) {
    %c0_i32 = arith.constant 0 : i32
    %c0_i32_0 = arith.constant 0 : i32
    return %arg0, %c0_i32 : i32, i32
  }
}

</mosaic_0001>

<bundles_post_ra>
// kernel: tpu_custom_call.1
= control target key start
LH: loop header
LB: loop body
LE: loop exit
PB: predicated region body
PF: predicated region fallthrough
CT: control target
= control target key end

     0   :  { %7 = vsyncpa [#allocation3], 0  ;;  %s834_s0 = inlined_call_operand.hbm [shape: bf16[128,256], index: 0, kind: input, shape index: {}]   ;;  %s835_s1 = inlined_call_operand.hbm [shape: bf16[256,128], index: 1, kind: input, shape index: {}]   ;;  %s836_s2 = inlined_call_operand.hbm [shape: bf16[128,128], index: 2, kind: output, shape index: {}]  }
   0x1   :  { %8 = vsyncpa [#allocation6], 0 }
   0x2   :  { %9 = vsyncpa [#allocation4], 0  ;;  %s770_s9 = smov [#allocation2]   ;;  %s698_s13 = scalar_lea.hbm %s834_s0, 2048 }
   0x3   :  { %s15_s10 = sshll.u32 %s770_s9, 4  ;;  %p699_p0 = scmp.ne.s32.totalorder %s834_s0, %s698_s13  ;;  %s16_s10 = int_to_ptr.vmem [resolvable:$true] %s15_s10 }
   0x4   :  { %p702_p1 = scmp.lt.u32.totalorder %s698_s13, %s834_s0 }
   0x6   :  { %p704_p2 = pnand %p702_p1, %p699_p0 }
   0x8   :  { %707 = shalt.err (!%p704_p2)
}
   0x9   :  { %s708_s18 = scalar_lea.vmem %s16_s10, 2048  ;;  %p713_p4 = scmp.lt.s32.totalorder %s16_s10, %s16_s10 }
   0xa   :  { %p709_p3 = scmp.ne.s32.totalorder %s16_s10, %s708_s18  ;;  %p714_p5 = scmp.lt.s32.totalorder %s708_s18, %s708_s18 }
   0xc   :  { %p715_p6 = por %p714_p5, %p713_p4 }
   0xe   :  { %p716_p7 = pnand %p715_p6, %p709_p3 }
  0x10   :  { %719 = shalt.err (!%p716_p7)
}
  0x11   :  { %s771_s19 = smov 128   ;;  %s772_s20 = smov 8  }
  0x12   :  { %21 = dma.hbm_to_vmem [thread:$0]  %s834_s0, 2048, %s16_s10, [#allocation3], %s771_s19, %s771_s19, %s772_s20  }
  0x13   :  { %s773_s23 = smov [#allocation5]   ;;  %s720_s27 = scalar_lea.hbm %s835_s1, 2048 }
  0x14   :  { %s27_s24 = sshll.u32 %s773_s23, 4  ;;  %p721_p8 = scmp.ne.s32.totalorder %s835_s1, %s720_s27  ;;  %s28_s24 = int_to_ptr.vmem [resolvable:$true] %s27_s24 }
  0x15   :  { %p724_p9 = scmp.lt.u32.totalorder %s720_s27, %s835_s1 }
  0x17   :  { %p726_p10 = pnand %p724_p9, %p721_p8 }
  0x19   :  { %729 = shalt.err (!%p726_p10)
}
  0x1a   :  { %s730_s4 = scalar_lea.vmem %s28_s24, 2048  ;;  %p735_p12 = scmp.lt.s32.totalorder %s28_s24, %s28_s24 }
  0x1b   :  { %p731_p11 = scmp.ne.s32.totalorder %s28_s24, %s730_s4  ;;  %p736_p13 = scmp.lt.s32.totalorder %s730_s4, %s730_s4 }
  0x1d   :  { %p737_p0 = por %p736_p13, %p735_p12 }
  0x1f   :  { %p738_p1 = pnand %p737_p0, %p731_p11 }
  0x21   :  { %741 = shalt.err (!%p738_p1)
}
  0x22   :  { %s774_s0 = smov 64   ;;  %s775_s5 = smov 4  }
  0x23   :  { %33 = dma.hbm_to_vmem [thread:$0]  %s835_s1, 2048, %s28_s24, [#allocation6], %s774_s0, %s774_s0, %s775_s5  }
  0x24   :  { %764 = dma.done.wait [#allocation3], 2048  }
  0x25   :  { %765 = vsyncadd [#allocation3], 4294965248 }
  0x26   :  { %766 = dma.done.wait [#allocation6], 2048  }
  0x27   :  { %767 = vsyncadd [#allocation6], 4294965248  ;;  %v658_v0 = vld [vmem:[#allocation5 + $0x40] sm:$0xff]   ;;  %v660_v2 = vld [vmem:[#allocation5 + $0x48] sm:$0xff]   ;;  %s776_s1 = smov [#allocation7]  }
  0x28   :  { %v659_v1 = vld [vmem:[#allocation5] sm:$0xff]   ;;  %571 = vmatprep.subr.bf16.mxu0 %v658_v0  ;;  %635 = vmatprep.subr.bf16.mxu1 %v658_v0  ;;  %v661_v3 = vld [vmem:[#allocation5 + $0x8] sm:$0xff]   ;;  %v662_v4 = vld [vmem:[#allocation5 + $0x50] sm:$0xff]   ;;  %s447_s8 = sshll.u32 %s776_s1, 4  ;;  %s448_s8 = int_to_ptr.vmem [resolvable:$true] %s447_s8 }
  0x29   :  { %572 = vmatpush3.bf16.msra.mxu0 %v659_v1  ;;  %643 = vmatpush3.bf16.msra.mxu1 %v659_v1  ;;  %v663_v5 = vld [vmem:[#allocation5 + $0x10] sm:$0xff]   ;;  %v664_v6 = vld [vmem:[#allocation5 + $0x58] sm:$0xff]   ;;  %v666_v8 = vld [vmem:[#allocation5 + $0x60] sm:$0xff]   ;;  %s742_s9 = scalar_lea.vmem %s448_s8, 1024  ;;  %p747_p3 = scmp.lt.s32.totalorder %s448_s8, %s448_s8 }
  0x2a   :  { %573 = vmatprep.subr.bf16.mxu0 %v660_v2  ;;  %636 = vmatprep.subr.bf16.mxu1 %v660_v2  ;;  %v665_v7 = vld [vmem:[#allocation5 + $0x18] sm:$0xff]   ;;  %v667_v9 = vld [vmem:[#allocation5 + $0x20] sm:$0xff]   ;;  %v668_v10 = vld [vmem:[#allocation5 + $0x68] sm:$0xff]   ;;  %p743_p2 = scmp.ne.s32.totalorder %s448_s8, %s742_s9  ;;  %p748_p4 = scmp.lt.s32.totalorder %s742_s9, %s742_s9 }
  0x2b   :  { %v676_v11 = vld [vmem:[#allocation2 + $0x4] ss:$8 sps:$4 sm:$0xff]   ;;  %v670_v14 = vld [vmem:[#allocation5 + $0x70] sm:$0xff]   ;;  %v672_v16 = vld [vmem:[#allocation5 + $0x78] sm:$0xff]  }
  0x2c   :  { %v679_v12 = vld [vmem:[#allocation2 + $0x44] ss:$8 sps:$4 sm:$0xff]   ;;  %297 = vmatprep.mubr.bf16.mxu0 %v676_v11  ;;  %v671_v15 = vld [vmem:[#allocation5 + $0x30] sm:$0xff]   ;;  %v673_v17 = vld [vmem:[#allocation5 + $0x38] sm:$0xff]   ;;  %p749_p5 = por %p748_p4, %p747_p3 }
  0x2d   :  { %574 = vmatpush3.bf16.msra.mxu0 %v661_v3  ;;  %644 = vmatpush3.bf16.msra.mxu1 %v661_v3  ;;  %v669_v13 = vld [vmem:[#allocation5 + $0x28] sm:$0xff]   ;;  %v680_v20 = vld [vmem:[#allocation2 + $0x14] ss:$8 sps:$4 sm:$0xff]   ;;  %v684_v22 = vld [vmem:[#allocation2 + $0x10] ss:$8 sps:$4 sm:$0xff]  }
  0x2e   :  { %575 = vmatprep.subr.bf16.mxu0 %v662_v4  ;;  %637 = vmatprep.subr.bf16.mxu1 %v662_v4  ;;  %v674_v18 = vld [vmem:[#allocation2] ss:$8 sps:$4 sm:$0xff]   ;;  %v682_v21 = vld [vmem:[#allocation2 + $0x54] ss:$8 sps:$4 sm:$0xff]   ;;  %v685_v23 = vld [vmem:[#allocation2 + $0x50] ss:$8 sps:$4 sm:$0xff]   ;;  %p750_p6 = pnand %p749_p5, %p743_p2 }
  0x2f   :  { %329 = vmatprep.mubr.bf16.mxu1 %v679_v12  ;;  %v677_v19 = vld [vmem:[#allocation2 + $0x40] ss:$8 sps:$4 sm:$0xff]   ;;  %v686_v24 = vld [vmem:[#allocation2 + $0x24] ss:$8 sps:$4 sm:$0xff]   ;;  %v692_v28 = vld [vmem:[#allocation2 + $0x34] ss:$8 sps:$4 sm:$0xff]  }
  0x30   :  { %v688_v25 = vld [vmem:[#allocation2 + $0x64] ss:$8 sps:$4 sm:$0xff]   ;;  %v690_v26 = vld [vmem:[#allocation2 + $0x20] ss:$8 sps:$4 sm:$0xff]   ;;  %v694_v29 = vld [vmem:[#allocation2 + $0x74] ss:$8 sps:$4 sm:$0xff]  }
  0x31   :  { %576 = vmatpush3.bf16.msra.mxu0 %v663_v5  ;;  %645 = vmatpush3.bf16.msra.mxu1 %v663_v5  ;;  %v691_v27 = vld [vmem:[#allocation2 + $0x60] ss:$8 sps:$4 sm:$0xff]   ;;  %v696_v30 = vld [vmem:[#allocation2 + $0x30] ss:$8 sps:$4 sm:$0xff]  }
  0x32   :  { %577 = vmatprep.subr.bf16.mxu0 %v664_v6  ;;  %638 = vmatprep.subr.bf16.mxu1 %v664_v6  ;;  %v697_v31 = vld [vmem:[#allocation2 + $0x70] ss:$8 sps:$4 sm:$0xff]  }
  0x35   :  { %578 = vmatpush3.bf16.msra.mxu0 %v665_v7  ;;  %646 = vmatpush3.bf16.msra.mxu1 %v665_v7 }
  0x36   :  { %579 = vmatprep.subr.bf16.mxu0 %v666_v8  ;;  %639 = vmatprep.subr.bf16.mxu1 %v666_v8 }
  0x39   :  { %580 = vmatpush3.bf16.msra.mxu0 %v667_v9  ;;  %647 = vmatpush3.bf16.msra.mxu1 %v667_v9 }
  0x3a   :  { %581 = vmatprep.subr.bf16.mxu0 %v668_v10  ;;  %640 = vmatprep.subr.bf16.mxu1 %v668_v10 }
  0x3d   :  { %582 = vmatpush3.bf16.msra.mxu0 %v669_v13  ;;  %648 = vmatpush3.bf16.msra.mxu1 %v669_v13 }
  0x3e   :  { %583 = vmatprep.subr.bf16.mxu0 %v670_v14  ;;  %641 = vmatprep.subr.bf16.mxu1 %v670_v14 }
  0x41   :  { %584 = vmatpush3.bf16.msra.mxu0 %v671_v15  ;;  %649 = vmatpush3.bf16.msra.mxu1 %v671_v15 }
  0x42   :  { %585 = vmatprep.subr.bf16.mxu0 %v672_v16  ;;  %642 = vmatprep.subr.bf16.mxu1 %v672_v16 }
  0x45   :  { %586 = vmatpush3.bf16.msra.mxu0 %v673_v17  ;;  %650 = vmatpush3.bf16.msra.mxu1 %v673_v17 }
  0x48   :  { %298 = vmatmul.mubr.bf16.vlgmr.msra.gmra.mrb[0].mxu0 %v674_v18  ;;  %330 = vmatmul.mubr.bf16.vlgmr.msra.gmra.mrb[0].mxu1 %v677_v19 }
  0x49   :  { %305 = vmatprep.mubr.bf16.mxu0 %v680_v20  ;;  %337 = vmatprep.mubr.bf16.mxu1 %v682_v21 }
  0x50   :  { %306 = vmatmul.mubr.bf16.gmra.mrb[4].mxu0 %v684_v22  ;;  %338 = vmatmul.mubr.bf16.gmra.mrb[4].mxu1 %v685_v23 }
  0x51   :  { %313 = vmatprep.mubr.bf16.mxu0 %v686_v24  ;;  %345 = vmatprep.mubr.bf16.mxu1 %v688_v25 }
  0x58   :  { %314 = vmatmul.mubr.bf16.gmra.mrb[8].mxu0 %v690_v26  ;;  %346 = vmatmul.mubr.bf16.gmra.mrb[8].mxu1 %v691_v27 }
  0x59   :  { %321 = vmatprep.mubr.bf16.mxu0 %v692_v28  ;;  %353 = vmatprep.mubr.bf16.mxu1 %v694_v29 }
  0x60   :  { %322 = vmatmul.mubr.bf16.gmra.mrb[12].mxu0 %v696_v30  ;;  %354 = vmatmul.mubr.bf16.gmra.mrb[12].mxu1 %v697_v31 }
 0x11b   :  { %v587_v32 = vpop.f32.mrb[0].mxu0  ;;  %v611_v33 = vpop.f32.mrb[0].mxu1 }
 0x11c   :  { %v588_v34 = vpop.f32.mrb[1].mxu0  ;;  %v612_v35 = vpop.f32.mrb[1].mxu1 }
 0x11d   :  { %v589_v36 = vadd.f32 %v588_v34, %v587_v32  ;;  %v613_v37 = vadd.f32 %v612_v35, %v611_v33  ;;  %v590_v38 = vpop.f32.mrb[2].mxu0  ;;  %v614_v39 = vpop.f32.mrb[2].mxu1 }
 0x11e   :  { %v591_v40 = vpop.f32.mrb[3].mxu0  ;;  %v615_v41 = vpop.f32.mrb[3].mxu1 }
 0x11f   :  { %v592_v42 = vadd.f32 %v591_v40, %v590_v38  ;;  %v616_v43 = vadd.f32 %v615_v41, %v614_v39 }
 0x121   :  { %v527_v44 = vpack.c.bf16 %v592_v42, %v589_v36  ;;  %v547_v45 = vpack.c.bf16 %v616_v43, %v613_v37 }
 0x123   :  { %528 = vst [vmem:[#allocation7] sm:$0xff] %v527_v44   ;;  %567 = vst [vmem:[#allocation7 + $0x20] sm:$0xff] %v547_v45   ;;  %v593_v46 = vpop.f32.mrb[4].mxu0  ;;  %v617_v47 = vpop.f32.mrb[4].mxu1 }
 0x124   :  { %v594_v48 = vpop.f32.mrb[5].mxu0  ;;  %v618_v49 = vpop.f32.mrb[5].mxu1 }
 0x125   :  { %v595_v50 = vadd.f32 %v594_v48, %v593_v46  ;;  %v619_v51 = vadd.f32 %v618_v49, %v617_v47  ;;  %v596_v52 = vpop.f32.mrb[6].mxu0  ;;  %v620_v53 = vpop.f32.mrb[6].mxu1 }
 0x126   :  { %v597_v54 = vpop.f32.mrb[7].mxu0  ;;  %v621_v55 = vpop.f32.mrb[7].mxu1 }
 0x127   :  { %v598_v56 = vadd.f32 %v597_v54, %v596_v52  ;;  %v622_v57 = vadd.f32 %v621_v55, %v620_v53 }
 0x129   :  { %v532_v58 = vpack.c.bf16 %v598_v56, %v595_v50  ;;  %v552_v59 = vpack.c.bf16 %v622_v57, %v619_v51 }
 0x12b   :  { %564 = vst [vmem:[#allocation7 + $0x8] sm:$0xff] %v532_v58   ;;  %568 = vst [vmem:[#allocation7 + $0x28] sm:$0xff] %v552_v59   ;;  %v599_v60 = vpop.f32.mrb[8].mxu0  ;;  %v623_v61 = vpop.f32.mrb[8].mxu1 }
 0x12c   :  { %v600_v62 = vpop.f32.mrb[9].mxu0  ;;  %v624_v63 = vpop.f32.mrb[9].mxu1 }
 0x12d   :  { %v601_v0 = vadd.f32 %v600_v62, %v599_v60  ;;  %v625_v1 = vadd.f32 %v624_v63, %v623_v61  ;;  %v602_v2 = vpop.f32.mrb[10].mxu0  ;;  %v626_v3 = vpop.f32.mrb[10].mxu1 }
 0x12e   :  { %v603_v4 = vpop.f32.mrb[11].mxu0  ;;  %v627_v5 = vpop.f32.mrb[11].mxu1 }
 0x12f   :  { %v604_v6 = vadd.f32 %v603_v4, %v602_v2  ;;  %v628_v7 = vadd.f32 %v627_v5, %v626_v3 }
 0x131   :  { %v537_v8 = vpack.c.bf16 %v604_v6, %v601_v0  ;;  %v557_v9 = vpack.c.bf16 %v628_v7, %v625_v1 }
 0x133   :  { %565 = vst [vmem:[#allocation7 + $0x10] sm:$0xff] %v537_v8   ;;  %569 = vst [vmem:[#allocation7 + $0x30] sm:$0xff] %v557_v9   ;;  %v605_v10 = vpop.f32.mrb[12].mxu0  ;;  %v629_v11 = vpop.f32.mrb[12].mxu1 }
 0x134   :  { %v606_v12 = vpop.f32.mrb[13].mxu0  ;;  %v630_v13 = vpop.f32.mrb[13].mxu1 }
 0x135   :  { %v607_v14 = vadd.f32 %v606_v12, %v605_v10  ;;  %v631_v15 = vadd.f32 %v630_v13, %v629_v11  ;;  %v608_v16 = vpop.f32.mrb[14].mxu0  ;;  %v632_v17 = vpop.f32.mrb[14].mxu1 }
 0x136   :  { %v609_v18 = vpop.f32.mrb[15].mxu0  ;;  %v633_v19 = vpop.f32.mrb[15].mxu1 }
 0x137   :  { %v610_v20 = vadd.f32 %v609_v18, %v608_v16  ;;  %v634_v21 = vadd.f32 %v633_v19, %v632_v17 }
 0x139   :  { %v542_v22 = vpack.c.bf16 %v610_v20, %v607_v14  ;;  %v562_v23 = vpack.c.bf16 %v634_v21, %v631_v15 }
 0x13b   :  { %566 = vst [vmem:[#allocation7 + $0x18] sm:$0xff] %v542_v22   ;;  %570 = vst [vmem:[#allocation7 + $0x38] sm:$0xff] %v562_v23  }
 0x13c   :  { %753 = shalt.err (!%p750_p6)
}
 0x13d   :  { %s754_s12 = scalar_lea.hbm %s836_s2, 1024 }
 0x13e   :  { %p755_p7 = scmp.ne.s32.totalorder %s836_s2, %s754_s12  ;;  %p758_p8 = scmp.lt.u32.totalorder %s754_s12, %s836_s2 }
 0x140   :  { %p760_p9 = pnand %p758_p8, %p755_p7 }
 0x142   :  { %763 = shalt.err (!%p760_p9)
}
 0x143   :  { %453 = dma.vmem_to_hbm [thread:$0]  %s448_s8, 1024, %s836_s2, [#allocation4], %s774_s0, %s774_s0, %s775_s5  }
 0x144   :  { %768 = dma.done.wait [#allocation4], 1024  }
 0x145   :  { %769 = vsyncadd [#allocation4], 4294966272 }
 0x146   :  { %457 = vsyncpa [#allocation3], 1 }
 0x147   :  { %458 = vsyncpa [#allocation6], 1 }
 0x148   :  { %459 = vsyncpa [#allocation4], 1 }

</bundles_post_ra>
